<compile_context>
chip_gen: v7x
topology: tpu7x:2x2x1
jax: 0.10.0
libtpu: 0.0.40
codegen_flags: <defaults>
</compile_context>

<pallas_src>
import functools

import jax
import jax.numpy as jnp
from jax.experimental import pallas as pl
from jax.experimental.pallas import tpu as pltpu

# Quantization parameters from the PyTorch module.
X_SCALE = 0.03
X_ZP = -66        # dequant: (x - X_ZP) * X_SCALE
Y_SCALE = 0.025
Y_ZP = 160        # dequant: (y - Y_ZP) * Y_SCALE
OUT_SCALE = X_SCALE * Y_SCALE


def _qmm_kernel(x_ref, y_ref, o_ref, acc_ref, xsum_ref, ysum_ref, *,
                use_int8, k_total):
    """One (batch, m-tile, n-tile, k-tile) grid step.

    x_ref   : (1, tm, tk) int8     raw quantized codes
    y_ref   : (1, tk, tn) uint8    raw quantized codes
    o_ref   : (1, tm, tn) float32
    acc_ref : (tm, tn)  i32/f32    matmul accumulator (persists over k)
    xsum_ref: (tm, 1)   i32/f32    sum_k x[m,k]   (zero-point correction)
    ysum_ref: (1, tn)   i32/f32    sum_k y'[k,n]  (zero-point correction)

    Dequant is folded algebraically so no per-element zero-point work feeds
    the MXU:
      sum_k (x - zx)(y - zy)
        = dot(x, y) - zy*rowsum(x) - zx*colsum(y) + K*zx*zy            (bf16)
        = dot(x, y-128) + (128-zy)*rowsum(x) - zx*colsum(y-128)
          - K*zx*(128-zy)                                              (int8)
    """
    k = pl.program_id(3)

    @pl.when(k == 0)
    def _init():
        acc_ref[...] = jnp.zeros_like(acc_ref)
        xsum_ref[...] = jnp.zeros_like(xsum_ref)
        ysum_ref[...] = jnp.zeros_like(ysum_ref)

    x = x_ref[0]   # (tm, tk) int8
    y = y_ref[0]   # (tk, tn) uint8

    if use_int8:
        # Native s8 x s8 -> i32 MXU mode (v5e/v6e).  Re-bias uint8 -> int8
        # (y' = y - 128, exact) so both operands are signed.  Exact in i32 for
        # K up to ~65k.
        y32 = y.astype(jnp.int32) - 128
        ys = y32.astype(jnp.int8)
        acc_ref[...] += jax.lax.dot_general(
            x, ys, (((1,), (0,)), ((), ())),
            preferred_element_type=jnp.int32)
        xsum_ref[...] += jnp.sum(x.astype(jnp.int32), axis=1, keepdims=True)
        ysum_ref[...] += jnp.sum(y32, axis=0, keepdims=True)
    else:
        # bf16 MXU path (mandatory on v7x: no integer MXU).  int8/uint8 codes
        # (|v| <= 255) are exactly representable in bf16, so the integer dot
        # is exact; only the f32 accumulation rounds (normal matmul tolerance).
        acc_ref[...] += jnp.dot(x.astype(jnp.bfloat16), y.astype(jnp.bfloat16),
                                preferred_element_type=jnp.float32)
        xsum_ref[...] += jnp.sum(x.astype(jnp.float32), axis=1, keepdims=True)
        ysum_ref[...] += jnp.sum(y.astype(jnp.float32), axis=0, keepdims=True)

    @pl.when(k == pl.num_programs(3) - 1)
    def _finalize():
        if use_int8:
            zint = (acc_ref[...]
                    + (128 - Y_ZP) * xsum_ref[...]          # -32  * rowsum(x)
                    + (-X_ZP) * ysum_ref[...]                # +66  * colsum(y')
                    + (-X_ZP) * (128 - Y_ZP) * k_total)      # -2112 * K
            o_ref[0, :, :] = zint.astype(jnp.float32) * jnp.float32(OUT_SCALE)
        else:
            zf = (acc_ref[...]
                  + jnp.float32(-Y_ZP) * xsum_ref[...]       # -160 * rowsum(x)
                  + jnp.float32(-X_ZP) * ysum_ref[...]       # +66  * colsum(y)
                  + jnp.float32(X_ZP * Y_ZP * k_total))      # -10560 * K
            o_ref[0, :, :] = zf * jnp.float32(OUT_SCALE)


def _pick_tile(dim, preferred, grains):
    """Largest tile <= `preferred` that divides `dim` and is a multiple of one
    of `grains` (tried in order).  Falls back to the full dim so the block
    always satisfies the TPU (8, 128) tiling rule."""
    if dim <= preferred:
        return dim
    for g in grains:
        t = (preferred // g) * g
        while t >= g:
            if dim % t == 0:
                return t
            t -= g
    # TODO(synk): pad + mask edge blocks instead of degrading to the full dim.
    return dim


@functools.partial(jax.jit, static_argnames=("tm", "tn", "tk", "fold", "mxu"))
def matmul_q_mixed_sign_i8(x, y, *, tm=512, tn=512, tk=1024, fold="auto",
                           mxu="auto"):
    """x: int8 [7, B, M, K]; y: uint8 [B|1, K, N] -> float32 [7, B, M, N]."""
    seven, B, M, K = x.shape
    By, Ky, N = y.shape
    assert Ky == K
    assert By in (B, 1), "torch.matmul batch broadcast needs By in {B, 1}"

    if fold == "auto":
        # Fold the "7" dim into M only when M alone would underfeed the MXU;
        # otherwise fold it into the batch axis, which is a *free* reshape
        # (no HBM transpose of x or of the f32 output).
        fold = "m" if M < 128 else "batch"

    if fold == "m":
        MM = seven * M
        xf = jnp.transpose(x, (1, 0, 2, 3)).reshape(B, MM, K)
        F = B
    else:
        MM = M
        xf = x.reshape(seven * B, M, K)
        F = seven * B

    tm = _pick_tile(MM, tm, (32, 8))     # sublane grain (32 for int8 operands)
    tn = _pick_tile(N, tn, (128,))       # lane grain
    tk = _pick_tile(K, tk, (128,))       # lane grain for x / sublanes for y
    grid = (F, MM // tm, N // tn, K // tk)

    if mxu == "auto":
        kind = jax.devices()[0].device_kind.lower()
        has_int8_mxu = ("v5" in kind) or ("v6" in kind)     # v7x: bf16 only
        aligned = (tm % 32 == 0) and (tn % 128 == 0) and (tk % 128 == 0)
        mxu = "int8" if (has_int8_mxu and aligned) else "bf16"
    use_int8 = mxu == "int8"
    acc_dtype = jnp.int32 if use_int8 else jnp.float32

    def x_index_map(f, i, j, k):
        return (f, i, k)

    def o_index_map(f, i, j, k):
        return (f, i, j)

    if By == 1:
        y_index_map = lambda f, i, j, k: (0, k, j)
    elif fold == "m":
        y_index_map = lambda f, i, j, k: (f, k, j)
    else:
        y_index_map = lambda f, i, j, k: (f % B, k, j)

    # VMEM working set (double-buffered I/O blocks + scratch); set the scoped
    # limit explicitly with headroom -- v7x only has 64 MiB of physical VMEM.
    vmem_ws = (2 * tm * tk              # x blocks (int8)
               + 2 * tk * tn            # y blocks (uint8)
               + 2 * tm * tn * 4        # out blocks (f32)
               + tm * tn * 4            # accumulator
               + (tm * 128 + 8 * tn) * 4)   # padded row/col-sum scratch
    vmem_limit = max(32 << 20, min(64 << 20, int(1.5 * vmem_ws) + (4 << 20)))

    # Actual HBM traffic: x is re-streamed once per n-tile, y once per
    # (batch, m-tile), the f32 output is written once.
    cost = pl.CostEstimate(
        flops=2 * seven * B * M * N * K,
        transcendentals=0,
        bytes_accessed=int(xf.size * (N // tn)
                           + F * (MM // tm) * K * N
                           + F * MM * N * 4),
    )

    kernel = functools.partial(_qmm_kernel, use_int8=use_int8, k_total=K)
    out = pl.pallas_call(
        kernel,
        out_shape=jax.ShapeDtypeStruct((F, MM, N), jnp.float32),
        grid_spec=pltpu.PrefetchScalarGridSpec(
            num_scalar_prefetch=0,
            grid=grid,
            in_specs=[
                pl.BlockSpec((1, tm, tk), x_index_map),
                pl.BlockSpec((1, tk, tn), y_index_map),
            ],
            out_specs=pl.BlockSpec((1, tm, tn), o_index_map),
            scratch_shapes=[
                pltpu.VMEM((tm, tn), acc_dtype),
                pltpu.VMEM((tm, 1), acc_dtype),
                pltpu.VMEM((1, tn), acc_dtype),
            ],
        ),
        compiler_params=pltpu.CompilerParams(
            dimension_semantics=("parallel", "parallel", "parallel",
                                 "arbitrary"),
            vmem_limit_bytes=vmem_limit,
        ),
        cost_estimate=cost,
    )(xf, y)

    if fold == "m":
        # [B, 7*M, N] -> [7, B, M, N]  (small copy; only taken for small M)
        return jnp.transpose(out.reshape(B, seven, M, N), (1, 0, 2, 3))
    # [7*B, M, N] -> [7, B, M, N]      (free reshape)
    return out.reshape(seven, B, M, N)


if __name__ == "__main__":
    key = jax.random.PRNGKey(0)
    kx, ky = jax.random.split(key)

    # Small shapes consistent with the module's annotations:
    #   x: [7, -1, -1, -1] int8 ; y: [-1, -1, -1] uint8
    seven, B, M, K, N = 7, 2, 32, 128, 128
    x = jax.random.randint(kx, (seven, B, M, K), -128, 128,
                           dtype=jnp.int32).astype(jnp.int8)
    y = jax.random.randint(ky, (B, K, N), 0, 256,
                           dtype=jnp.int32).astype(jnp.uint8)

    # Pure-JAX reference for correctness.
    x_f = (x.astype(jnp.float32) - X_ZP) * X_SCALE
    y_f = (y.astype(jnp.float32) - Y_ZP) * Y_SCALE
    z_ref = jnp.einsum("sbmk,bkn->sbmn", x_f, y_f,
                       precision=jax.lax.Precision.HIGHEST)

    # Exercise both fold strategies and both MXU paths ("auto" picks the
    # native int8 MXU on v5/v6, bf16 elsewhere; bf16 is checked explicitly).
    for fold in ("batch", "m"):
        for mxu in ("bf16", "auto"):
            z = jax.block_until_ready(
                matmul_q_mixed_sign_i8(x, y, fold=fold, mxu=mxu))
            assert z.shape == (seven, B, M, N)
            assert jnp.allclose(z, z_ref, atol=1e-2, rtol=1e-4), (fold, mxu)

    print("KERNEL_OK")
</pallas_src>

<mosaic_0001>
module attributes {stable_mosaic.version = 11 : i64} {
  func.func @_qmm_kernel(%arg0: i32, %arg1: i32, %arg2: i32, %arg3: i32, %arg4: memref<1x32x128xi8, #tpu.memory_space<vmem>>, %arg5: memref<1x128x128xi8, #tpu.memory_space<vmem>>, %arg6: memref<1x32x128xf32, #tpu.memory_space<vmem>>, %arg7: memref<32x128xf32, #tpu.memory_space<vmem>>, %arg8: memref<32x1xf32, #tpu.memory_space<vmem>>, %arg9: memref<1x128xf32, #tpu.memory_space<vmem>>) attributes {dimension_semantics = [#tpu.dimension_semantics<parallel>, #tpu.dimension_semantics<parallel>, #tpu.dimension_semantics<parallel>, #tpu.dimension_semantics<arbitrary>], iteration_bounds = array<i64: 14, 1, 1, 1>, scalar_prefetch = 0 : i64, scratch_operands = 3 : i64, tpu.core_type = #tpu.core_type<tc>, window_params = [{transform_indices = @transform_0, window_bounds = array<i64: 1, 32, 128>}, {transform_indices = @transform_1, window_bounds = array<i64: 1, 128, 128>}, {transform_indices = @transform_2, window_bounds = array<i64: 1, 32, 128>}]} {
    %c0_i32 = arith.constant 0 : i32
    %0 = arith.cmpi eq, %arg3, %c0_i32 : i32
    %1 = arith.extui %0 : i1 to i32
    %c0_i32_0 = arith.constant 0 : i32
    %2 = arith.cmpi ne, %1, %c0_i32_0 : i32
    scf.if %2 {
      %cst_22 = arith.constant 0.000000e+00 : f32
      %28 = vector.broadcast %cst_22 : f32 to vector<32x128xf32>
      %c0_23 = arith.constant 0 : index
      %c0_24 = arith.constant 0 : index
      %29 = vector.load %arg7[%c0_23, %c0_24] : memref<32x128xf32, #tpu.memory_space<vmem>>, vector<32x128xf32>
      tpu.vector_store %arg7[%c0_23, %c0_24], %28 {strides = array<i32>} : memref<32x128xf32, #tpu.memory_space<vmem>>, vector<32x128xf32>,
      %cst_25 = arith.constant 0.000000e+00 : f32
      %30 = vector.broadcast %cst_25 : f32 to vector<32x1xf32>
      %c0_26 = arith.constant 0 : index
      %c0_27 = arith.constant 0 : index
      %31 = vector.load %arg8[%c0_26, %c0_27] : memref<32x1xf32, #tpu.memory_space<vmem>>, vector<32x1xf32>
      tpu.vector_store %arg8[%c0_26, %c0_27], %30 {strides = array<i32>} : memref<32x1xf32, #tpu.memory_space<vmem>>, vector<32x1xf32>,
      %cst_28 = arith.constant 0.000000e+00 : f32
      %32 = vector.broadcast %cst_28 : f32 to vector<1x128xf32>
      %c0_29 = arith.constant 0 : index
      %c0_30 = arith.constant 0 : index
      %33 = vector.load %arg9[%c0_29, %c0_30] : memref<1x128xf32, #tpu.memory_space<vmem>>, vector<1x128xf32>
      tpu.vector_store %arg9[%c0_29, %c0_30], %32 {strides = array<i32>} : memref<1x128xf32, #tpu.memory_space<vmem>>, vector<1x128xf32>,
    } else {
    }
    %c0 = arith.constant 0 : index
    %c0_1 = arith.constant 0 : index
    %c0_2 = arith.constant 0 : index
    %3 = vector.load %arg4[%c0, %c0_1, %c0_2] : memref<1x32x128xi8, #tpu.memory_space<vmem>>, vector<1x32x128xi8>
    %4 = vector.shape_cast %3 : vector<1x32x128xi8> to vector<32x128xi8>
    %c0_3 = arith.constant 0 : index
    %c0_4 = arith.constant 0 : index
    %c0_5 = arith.constant 0 : index
    %5 = vector.load %arg5[%c0_3, %c0_4, %c0_5] : memref<1x128x128xi8, #tpu.memory_space<vmem>>, vector<1x128x128xi8>
    %6 = vector.shape_cast %5 : vector<1x128x128xi8> to vector<128x128xi8>
    %c0_6 = arith.constant 0 : index
    %c0_7 = arith.constant 0 : index
    %7 = vector.load %arg7[%c0_6, %c0_7] : memref<32x128xf32, #tpu.memory_space<vmem>>, vector<32x128xf32>
    %8 = arith.sitofp %4 : vector<32x128xi8> to vector<32x128xbf16>
    %9 = arith.uitofp %6 : vector<128x128xi8> to vector<128x128xbf16>
    %cst = arith.constant dense<0.000000e+00> : vector<32x128xf32>
    %10 = tpu.matmul %8, %9, %cst {dimension_numbers = #tpu.dot_dimension_numbers<[1], [0], [0], [1], [0, 0, 1, 1], [], []>} : vector<32x128xbf16>, vector<128x128xbf16>, vector<32x128xf32> -> vector<32x128xf32>
    %11 = arith.addf %7, %10 : vector<32x128xf32>
    %c0_8 = arith.constant 0 : index
    %c0_9 = arith.constant 0 : index
    %12 = vector.load %arg7[%c0_8, %c0_9] : memref<32x128xf32, #tpu.memory_space<vmem>>, vector<32x128xf32>
    tpu.vector_store %arg7[%c0_8, %c0_9], %11 {strides = array<i32>} : memref<32x128xf32, #tpu.memory_space<vmem>>, vector<32x128xf32>,
    %c0_10 = arith.constant 0 : index
    %c0_11 = arith.constant 0 : index
    %13 = vector.load %arg8[%c0_10, %c0_11] : memref<32x1xf32, #tpu.memory_space<vmem>>, vector<32x1xf32>
    %14 = arith.sitofp %4 : vector<32x128xi8> to vector<32x128xf32>
    %cst_12 = arith.constant dense<0.000000e+00> : vector<32xf32>
    %15 = vector.multi_reduction <add>, %14, %cst_12 [1] : vector<32x128xf32> to vector<32xf32>
    %16 = vector.shape_cast %15 : vector<32xf32> to vector<32x1xf32>
    %17 = arith.addf %13, %16 : vector<32x1xf32>
    %c0_13 = arith.constant 0 : index
    %c0_14 = arith.constant 0 : index
    %18 = vector.load %arg8[%c0_13, %c0_14] : memref<32x1xf32, #tpu.memory_space<vmem>>, vector<32x1xf32>
    tpu.vector_store %arg8[%c0_13, %c0_14], %17 {strides = array<i32>} : memref<32x1xf32, #tpu.memory_space<vmem>>, vector<32x1xf32>,
    %c0_15 = arith.constant 0 : index
    %c0_16 = arith.constant 0 : index
    %19 = vector.load %arg9[%c0_15, %c0_16] : memref<1x128xf32, #tpu.memory_space<vmem>>, vector<1x128xf32>
    %20 = arith.uitofp %6 : vector<128x128xi8> to vector<128x128xf32>
    %cst_17 = arith.constant dense<0.000000e+00> : vector<128xf32>
    %21 = vector.multi_reduction <add>, %20, %cst_17 [0] : vector<128x128xf32> to vector<128xf32>
    %22 = vector.shape_cast %21 : vector<128xf32> to vector<1x128xf32>
    %23 = arith.addf %19, %22 : vector<1x128xf32>
    %c0_18 = arith.constant 0 : index
    %c0_19 = arith.constant 0 : index
    %24 = vector.load %arg9[%c0_18, %c0_19] : memref<1x128xf32, #tpu.memory_space<vmem>>, vector<1x128xf32>
    tpu.vector_store %arg9[%c0_18, %c0_19], %23 {strides = array<i32>} : memref<1x128xf32, #tpu.memory_space<vmem>>, vector<1x128xf32>,
    %c0_i32_20 = arith.constant 0 : i32
    %25 = arith.cmpi eq, %arg3, %c0_i32_20 : i32
    %26 = arith.extui %25 : i1 to i32
    %c0_i32_21 = arith.constant 0 : i32
    %27 = arith.cmpi ne, %26, %c0_i32_21 : i32
    scf.if %27 {
      %c0_22 = arith.constant 0 : index
      %c0_23 = arith.constant 0 : index
      %28 = vector.load %arg7[%c0_22, %c0_23] : memref<32x128xf32, #tpu.memory_space<vmem>>, vector<32x128xf32>
      %c0_24 = arith.constant 0 : index
      %c0_25 = arith.constant 0 : index
      %29 = vector.load %arg8[%c0_24, %c0_25] : memref<32x1xf32, #tpu.memory_space<vmem>>, vector<32x1xf32>
      %cst_26 = arith.constant -1.600000e+02 : f32
      %30 = vector.broadcast %cst_26 : f32 to vector<32x1xf32>
      %31 = arith.mulf %30, %29 : vector<32x1xf32>
      %32 = vector.broadcast %31 : vector<32x1xf32> to vector<32x128xf32>
      %33 = arith.addf %28, %32 : vector<32x128xf32>
      %c0_27 = arith.constant 0 : index
      %c0_28 = arith.constant 0 : index
      %34 = vector.load %arg9[%c0_27, %c0_28] : memref<1x128xf32, #tpu.memory_space<vmem>>, vector<1x128xf32>
      %cst_29 = arith.constant 6.600000e+01 : f32
      %35 = vector.broadcast %cst_29 : f32 to vector<1x128xf32>
      %36 = arith.mulf %35, %34 : vector<1x128xf32>
      %37 = vector.broadcast %36 : vector<1x128xf32> to vector<32x128xf32>
      %38 = arith.addf %33, %37 : vector<32x128xf32>
      %cst_30 = arith.constant -1.351680e+06 : f32
      %39 = vector.broadcast %cst_30 : f32 to vector<32x128xf32>
      %40 = arith.addf %38, %39 : vector<32x128xf32>
      %cst_31 = arith.constant 7.500000e-04 : f32
      %41 = vector.broadcast %cst_31 : f32 to vector<32x128xf32>
      %42 = arith.mulf %40, %41 : vector<32x128xf32>
      %c0_32 = arith.constant 0 : index
      %c0_33 = arith.constant 0 : index
      %c0_34 = arith.constant 0 : index
      %43 = vector.load %arg6[%c0_32, %c0_33, %c0_34] : memref<1x32x128xf32, #tpu.memory_space<vmem>>, vector<1x32x128xf32>
      %44 = vector.shape_cast %43 : vector<1x32x128xf32> to vector<32x128xf32>
      %45 = vector.shape_cast %42 : vector<32x128xf32> to vector<1x32x128xf32>
      tpu.vector_store %arg6[%c0_32, %c0_33, %c0_34], %45 {strides = array<i32>} : memref<1x32x128xf32, #tpu.memory_space<vmem>>, vector<1x32x128xf32>,
    } else {
    }
    return
  }
  func.func @transform_0(%arg0: i32, %arg1: i32, %arg2: i32, %arg3: i32) -> (i32, i32, i32) {
    %c0_i32 = arith.constant 0 : i32
    return %arg0, %arg1, %arg3 : i32, i32, i32
  }
  func.func @transform_1(%arg0: i32, %arg1: i32, %arg2: i32, %arg3: i32) -> (i32, i32, i32) {
    %c2_i32 = arith.constant 2 : i32
    %c0_i32 = arith.constant 0 : i32
    %0 = arith.cmpi eq, %c2_i32, %c0_i32 : i32
    %c1_i32 = arith.constant 1 : i32
    %1 = arith.select %0, %c1_i32, %c2_i32 : i32
    %2 = arith.remsi %arg0, %1 : i32
    %c0_i32_0 = arith.constant 0 : i32
    %3 = arith.cmpi ne, %2, %c0_i32_0 : i32
    %c0_i32_1 = arith.constant 0 : i32
    %4 = arith.cmpi slt, %2, %c0_i32_1 : i32
    %c0_i32_2 = arith.constant 0 : i32
    %5 = arith.cmpi slt, %1, %c0_i32_2 : i32
    %6 = arith.xori %4, %5 : i1
    %7 = arith.andi %6, %3 : i1
    %8 = arith.addi %2, %1 : i32
    %9 = arith.select %7, %8, %2 : i32
    %c0_i32_3 = arith.constant 0 : i32
    return %9, %arg3, %arg2 : i32, i32, i32
  }
  func.func @transform_2(%arg0: i32, %arg1: i32, %arg2: i32, %arg3: i32) -> (i32, i32, i32) {
    %c0_i32 = arith.constant 0 : i32
    return %arg0, %arg1, %arg2 : i32, i32, i32
  }
}

</mosaic_0001>

<bundles_post_ra>
// kernel: matmul_q_mixed_sign_i8.1
= control target key start
LH: loop header
LB: loop body
LE: loop exit
PB: predicated region body
PF: predicated region fallthrough
CT: control target
= control target key end

     0   :  { %s1339_s0 = inlined_call_operand.hbm [shape: s8[14,32,128], index: 0, kind: input, shape index: {}]   ;;  %s1340_s1 = inlined_call_operand.hbm [shape: u8[2,128,128], index: 1, kind: input, shape index: {}]   ;;  %s1341_s2 = inlined_call_operand.hbm [shape: f32[14,32,128], index: 2, kind: output, shape index: {}]  }
   0x1   :  { %1346 = sst [smem:[#allocation16_spill]] %s1339_s0 }
   0x2   :  { %7 = vsyncpa [#allocation6], 0 }
   0x3   :  { %9 = vsyncpa [#allocation6 + $0x1], 0 }
   0x4   :  { %10 = vsyncpa [#allocation9], 0 }
   0x5   :  { %12 = vsyncpa [#allocation9 + $0x1], 0 }
   0x6   :  { %13 = vsyncpa [#allocation7], 0 }
   0x7   :  { %15 = vsyncpa [#allocation7 + $0x1], 0  ;;  %s1038_s9 = smov 0   ;;  %s1040_s10 = smov 0  }
   0x8   :  { %s1042_s11 = smov 0   ;;  %s1044_s12 = smov 0  }
   0x9   :  { %s1046_s13 = smov 0   ;;  %s1048_s14 = smov 0  }
   0xa   :  { %s1050_s15 = smov 0   ;;  %s1052_s16 = smov 0  }
   0xb   :  { %s1054_s17 = smov 0  }
   0xc LB: > { %s684_s18 = sadd.s32 4294967295, %s1012_s17   ;;  %s685_s19 = sadd.s32 4294967294, %s1012_s17   ;;  %s1012_s17 = sphi %s1054_s17, %s21_s17   ;;  %s1008_s16 = sphi %s1052_s16, %s1374_s16   ;;  %s1004_s15 = sphi %s1050_s15, %s1373_s15   ;;  %s1000_s14 = sphi %s1048_s14, %s1372_s14   ;;  %s996_s13 = sphi %s1046_s13, %s1371_s13   ;;  %s992_s12 = sphi %s1044_s12, %s1370_s12   ;;  %s988_s11 = sphi %s1042_s11, %s1369_s11   ;;  %s984_s10 = sphi %s1040_s10, %s1368_s10   ;;  %s980_s9 = sphi %s1038_s9, %s1367_s9  }
   0xd   : > { %s47_s20 = sadd.s32 1, %s1008_s16  ;;  %s58_s21 = sadd.s32 1, %s1000_s14 }
   0xe   : > { %p49_p0 = scmp.ge.s32.totalorder %s47_s20, 14  ;;  %p65_p1 = scmp.ne.s32.totalorder %s1000_s14, %s996_s13 }
   0xf   : > { %p66_p2 = scmp.eq.s32.totalorder %s1012_s17, 0  ;;  %p71_p3 = scmp.ne.s32.totalorder %s996_s13, %s992_s12 }
  0x10   : > { %s1376_s20 = smov (%p49_p0, %s47_s20), 0  ;;  %p72_p5 = scmp.eq.s32.totalorder %s684_s18, 0 }
  0x11   : > { %1347 = sst [smem:[#allocation14_spill]] %s1376_s20  ;;  %p1095_p4 = por %p66_p2, %p65_p1 }
  0x12   : > { %s51_s23 = ssub.s32 %s1008_s16, %s1376_s20  ;;  %p119_p6 = scmp.ne.s32.totalorder %s988_s11, %s984_s10 }
  0x13   : > { %p56_p7 = scmp.eq.s32.totalorder %s51_s23, 0  ;;  %p1106_p8 = por %p72_p5, %p71_p3 }
  0x14   : > { %p1110_p9 = por %p119_p6, %p66_p2  ;;  %p125_p10 = scmp.ne.s32.totalorder %s984_s10, %s980_s9 }
  0x15   : > { %s1349_s24 = scalar_select %p1106_p8, 1, 0 }
  0x16   : > { %s1116_s26 = scalar_select %p56_p7, %s1000_s14, %s58_s21  }
  0x17   : > { %p1118_p11 = por %p125_p10, %p72_p5  ;;  %p153_p12 = scmp.eq.s32.totalorder %s684_s18, 13 }
  0x18   : > { %1351 = sst [smem:[#allocation15_spill]] %s1116_s26  ;;  %p159_p13 = scmp.eq.s32.totalorder %s685_s19, 13 }
  0x19   : > { %s1352_s27 = scalar_select %p1118_p11, 1, 0 }
  0x1a   : > { %p1125_p0 = por %p153_p12, %p65_p1  ;;  %p760_p2 = scmp.lt.s32.totalorder %s1012_s17, 14 }
  0x1b   : > { %p1133_p6 = por %p159_p13, %p71_p3  ;;  %s179_s30 = sand.u32 1, %s1000_s14  }
  0x1c   : > { %s1353_s28 = scalar_select %p1125_p0, 1, 0 }
  0x1d   : > { %s1354_s29 = scalar_select %p1133_p6, 1, 0 }
  0x1e   : > { %s694_s3 = sshll.u32 %s179_s30, 3  ;;  %s695_s4 = sshll.u32 %s1008_s16, 7 }
  0x1f   : > { %s1355_s0 = sld [smem:[#allocation16_spill]]  ;;  %s183_s8 = scalar_lea.vmem [#allocation5], %s694_s3 }
  0x20   : > { %s192_s9 = sshll.u32 %s183_s8, 4  ;;  %p1148_p1 = pnand %p760_p2, %p1095_p4  ;;  %s1144_s9 = int_to_ptr.vmem [resolvable:$true] %s192_s9 }
  0x21   : > { %p1154_p3 = pnand %p760_p2, %p1110_p9  ;;  %s180_s21 = scalar_lea.sflag [#allocation6], %s179_s30 }
  0x22   : > { %p844_p12 = pneg %p1148_p1 }
  0x25   : > { %s1142_s7 = scalar_lea.hbm %s1355_s0, %s695_s4  ;;  %s847_s25 = scalar_lea.hbm %s1355_s0, 1792 }
  0x26   : > { %s842_s23 = scalar_lea.hbm %s1142_s7, 128  ;;  %p848_p9 = scmp.lt.u32.totalorder %s1142_s7, %s1355_s0 }
  0x27   : > { %p843_p10 = scmp.ne.s32.totalorder %s1142_s7, %s842_s23  ;;  %p849_p2 = scmp.lt.u32.totalorder %s847_s25, %s842_s23 }
  0x28   : > { %p851_p7 = scmp.lt.u32.totalorder %s842_s23, %s1142_s7 }
  0x29   : > { %p845_p4 = pnand %p844_p12, %p843_p10  ;;  %p850_p5 = por %p849_p2, %p848_p9 }
  0x2b   : > { %p846_p13 = pneg %p845_p4  ;;  %p852_p6 = por %p851_p7, %p850_p5 }
  0x2d   : > { %p853_p0 = pnand %p852_p6, %p846_p13 }
  0x2f   : > { %856 = shalt.err (!%p853_p0)
}
  0x30   : > { %s857_s30 = scalar_lea.vmem %s1144_s9, 128  ;;  %s1014_s6 = smov [#allocation5]  }
  0x31   : > { %p858_p10 = scmp.ne.s32.totalorder %s1144_s9, %s857_s30  ;;  %s862_s8 = sshll.u32 %s1014_s6, 4  ;;  %s863_s8 = int_to_ptr.vmem [resolvable:$false] %s862_s8 }
  0x32   : > { %s864_s22 = scalar_lea.vmem %s863_s8, 256  ;;  %p865_p8 = scmp.lt.s32.totalorder %s1144_s9, %s863_s8 }
  0x33   : > { %p860_p4 = pnand %p858_p10, %p844_p12  ;;  %p866_p9 = scmp.lt.s32.totalorder %s864_s22, %s857_s30 }
  0x35   : > { %p861_p11 = pneg %p860_p4  ;;  %p867_p2 = por %p866_p9, %p865_p8 }
  0x37   : > { %p868_p5 = pnand %p867_p2, %p861_p11 }
  0x39   : > { %871 = shalt.err (!%p868_p5)
}
  0x3a   : > { %752 = dma.hbm_to_vmem [thread:$0]  (!%p1148_p1), %s1142_s7, 128, %s1144_s9, %s180_s21  }
  0x3b   : > { %p1358_p0 = scmp.lt.s32.totalorder %s1012_s17, 15  ;;  %p1359_p6 = scmp.ge.s32.totalorder %s1012_s17, 1 }
  0x3c   : > { %s82_s3 = ssub.s32 0, %s1008_s16  ;;  %s94_s4 = ssub.s32 0, %s1376_s20 }
  0x3d   : > { %p1189_p7 = pnand %p1359_p6, %p1358_p0  ;;  %s686_s25 = smin.u32 %s1008_s16, %s82_s3 }
  0x3e   : > { %s84_s18 = sand.u32 1, %s686_s25   ;;  %s689_s5 = smin.u32 %s94_s4, %s1376_s20 }
  0x3f   : > { %s96_s30 = sand.u32 1, %s689_s5   ;;  %s112_s6 = sadd.s32 1, %s988_s11 }
  0x40   : > { %p688_p8 = scmp.lt.s32.totalorder %s84_s18, 0  ;;  %s91_s8 = sadd.s32 2, %s84_s18 }
  0x41   : > { %s199_s22 = sand.u32 1, %s988_s11   ;;  %p691_p11 = scmp.lt.s32.totalorder %s96_s30, 0 }
  0x42   : > { %s1378_s8 = smov (!%p688_p8, %s91_s8), %s84_s18  ;;  %s696_s7 = sshll.u32 %s199_s22, 5 }
  0x43   : > { %s103_s9 = sadd.s32 2, %s96_s30  ;;  %s711_s21 = sshll.u32 %s1378_s8, 9 }
  0x44   : > { %s1380_s9 = smov (!%p691_p11, %s103_s9), %s96_s30  ;;  %s1202_s3 = scalar_lea.hbm %s1340_s1, %s711_s21 }
  0x45   : > { %s203_s25 = scalar_lea.vmem [#allocation8], %s696_s7  ;;  %s105_s5 = ssub.s32 %s1378_s8, %s1380_s9 }
  0x46   : > { %s225_s4 = sshll.u32 %s203_s25, 4  ;;  %p110_p1 = scmp.eq.s32.totalorder %s105_s5, 0  ;;  %s1204_s4 = int_to_ptr.vmem [resolvable:$true] %s225_s4 }
  0x47   : > { %s1209_s20 = scalar_lea.sflag [#allocation9], %s199_s22  ;;  %s872_s30 = scalar_lea.hbm %s1202_s3, 512 }
  0x48   : > { %s1207_s18 = scalar_select %p110_p1, %s988_s11, %s112_s6  }
  0x49   : > { %p873_p12 = scmp.ne.s32.totalorder %s1202_s3, %s872_s30  ;;  %p874_p13 = pneg %p1154_p3 }
  0x4a   : > { %s877_s7 = scalar_lea.hbm %s1340_s1, 1024  ;;  %p878_p9 = scmp.lt.u32.totalorder %s1202_s3, %s1340_s1 }
  0x4b   : > { %p875_p10 = pnand %p874_p13, %p873_p12  ;;  %p879_p2 = scmp.lt.u32.totalorder %s877_s7, %s872_s30 }
  0x4c   : > { %p881_p0 = scmp.lt.u32.totalorder %s872_s30, %s1202_s3 }
  0x4d   : > { %p876_p4 = pneg %p875_p10  ;;  %p880_p5 = por %p879_p2, %p878_p9 }
  0x4f   : > { %p882_p6 = por %p881_p0, %p880_p5 }
  0x51   : > { %p883_p8 = pnand %p882_p6, %p876_p4 }
  0x53   : > { %886 = shalt.err (!%p883_p8)
}
  0x54   : > { %s887_s6 = scalar_lea.vmem %s1204_s4, 512  ;;  %s1015_s22 = smov [#allocation8]  }
  0x55   : > { %p888_p11 = scmp.ne.s32.totalorder %s1204_s4, %s887_s6  ;;  %s892_s21 = sshll.u32 %s1015_s22, 4  ;;  %s893_s21 = int_to_ptr.vmem [resolvable:$false] %s892_s21 }
  0x56   : > { %s894_s25 = scalar_lea.vmem %s893_s21, 1024  ;;  %p895_p10 = scmp.lt.s32.totalorder %s1204_s4, %s893_s21 }
  0x57   : > { %p890_p1 = pnand %p888_p11, %p874_p13  ;;  %p896_p9 = scmp.lt.s32.totalorder %s894_s25, %s887_s6 }
  0x59   : > { %p891_p12 = pneg %p890_p1  ;;  %p897_p2 = por %p896_p9, %p895_p10 }
  0x5b   : > { %p898_p5 = pnand %p897_p2, %p891_p12 }
  0x5d   : > { %901 = shalt.err (!%p898_p5)
}
  0x5e   : > { %s1016_s5 = smov 128   ;;  %s1017_s30 = smov 8  }
  0x5f   : > { %755 = dma.hbm_to_vmem [thread:$0]  (!%p1154_p3), %s1202_s3, 512, %s1204_s4, %s1209_s20, %s1016_s5, %s1016_s5, %s1017_s30  }
  0x60   : > { %237 = sbr.rel (%p1189_p7) target bundleno = 430 (0x1ae), region = 28  ;;  %s1240_s0 = sand.u32 (!%p1189_p7), 1, %s996_s13  }
  0x61   : > { %s703_s26 = sshll.u32 (!%p1189_p7), %s1240_s0, 3  ;;  %s240_s7 = scalar_lea.sflag (!%p1189_p7), [#allocation6], %s1240_s0 }
  0x62   : > { %s243_s8 = scalar_lea.vmem (!%p1189_p7), [#allocation5], %s703_s26  ;;  %p1361_p13 = scmp.ne.s32.totalorder (!%p1189_p7), %s1349_s24, 0 }
  0x67   : > { %967 = dma.done.wait (%p1361_p13), %s240_s7, 128  }
  0x68   : > { %969 = vsyncadd (%p1361_p13), %s240_s7, 4294967168  ;;  %s248_s20 = sand.u32 1, %s984_s10   ;;  %p1362_p3 = scmp.ne.s32.totalorder %s1352_s27, 0 }
  0x69   : > { %s704_s19 = sshll.u32 %s248_s20, 5  ;;  %s249_s23 = scalar_lea.sflag [#allocation9], %s248_s20 }
  0x6a   : > { %s1249_s3 = scalar_lea.vmem [#allocation8], %s704_s19 }
  0x6b   : > { %971 = dma.done.wait (%p1362_p3), %s249_s23, 512  }
  0x6c   : > { %973 = vsyncadd (%p1362_p3), %s249_s23, 4294966784  ;;  %vm301_vm0 = vcmask 7168   ;;  %v1018_v0 = vmov 0.0   ;;  %v1259_v1 = vld [vmem:[%s243_s8] sm:$0xff]  ;;  %v308_v2 = vld [vmem:[%s1249_s3] sm:$0xff]  ;;  %s705_s24 = sshll.u32 %s1240_s0, 5 }
  0x6d   : > { %302 = vst.msk [vmem:[#allocation3] sm:$0xff] %vm301_vm0, %v1018_v0  ;;  %306 = vst [vmem:[#allocation4] sm:$0x1] %v1018_v0  ;;  %v387_v3 = vunpack.c.0.s8 %v1259_v1  ;;  %v388_v4 = vunpack.c.1.s8 %v1259_v1  ;;  %v389_v5 = vunpack.c.2.s8 %v1259_v1  ;;  %v390_v6 = vunpack.c.3.s8 %v1259_v1  ;;  %v309_v18 = vld [vmem:[%s1249_s3 + $0x8] sm:$0xff]  ;;  %v310_v34 = vld [vmem:[%s1249_s3 + $0x10] sm:$0xff]  ;;  %s277_s27 = scalar_lea.vmem [#allocation10], %s705_s24 }
  0x6e   : > { %303 = vst.msk [vmem:[#allocation3 + $0x8] sm:$0xff] %vm301_vm0, %v1018_v0  ;;  %304 = vst.msk [vmem:[#allocation3 + $0x10] sm:$0xff] %vm301_vm0, %v1018_v0  ;;  %v318_v7 = vunpack.c.l.u8.bf16 %v308_v2  ;;  %v413_v8 = vunpack.c.0.s8 %v308_v2  ;;  %v414_v9 = vunpack.c.1.s8 %v308_v2  ;;  %v415_v10 = vunpack.c.2.s8 %v308_v2  ;;  %v311_v54 = vld [vmem:[%s1249_s3 + $0x18] sm:$0xff]  ;;  %s564_s4 = sshll.u32 %s277_s27, 4  ;;  %s712_s9 = sshll.u32 %s1004_s15, 9  ;;  %s1277_s4 = int_to_ptr.vmem [resolvable:$true] %s564_s4 }
  0x6f   : > { %305 = vst.msk [vmem:[#allocation3 + $0x18] sm:$0xff] %vm301_vm0, %v1018_v0  ;;  %v391_v11 = vcvt.s32.f32 %v387_v3  ;;  %v392_v12 = vcvt.s32.f32 %v388_v4  ;;  %v393_v13 = vcvt.s32.f32 %v389_v5  ;;  %v416_v14 = vunpack.c.3.s8 %v308_v2  ;;  %s1282_s21 = scalar_lea.hbm %s1341_s2, %s712_s9  ;;  %s548_s25 = scalar_lea.sflag [#allocation7], %s1240_s0 }
  0x70   : > { %723 = vmatprep.subr.bf16.mxu0 %v318_v7  ;;  %v429_v15 = vand.u32 255, %v413_v8  ;;  %v430_v16 = vand.u32 255, %v414_v9  ;;  %v431_v17 = vand.u32 255, %v415_v10  ;;  %v394_v19 = vcvt.s32.f32 %v390_v6  ;;  %s902_s5 = scalar_lea.vmem %s1277_s4, 512  ;;  %p1363_p4 = scmp.ne.s32.totalorder %s1353_s28, 0 }
  0x71   : > { %395 = vadd.xlane.f32.xlu0 %v391_v11  ;;  %399 = vadd.xlane.f32.xlu1 %v393_v13  ;;  %v319_v20 = vunpack.c.h.u8.bf16 %v308_v2  ;;  %v417_v21 = vunpack.c.0.s8 %v309_v18  ;;  %v418_v22 = vunpack.c.1.s8 %v309_v18  ;;  %v432_v23 = vand.u32 255, %v416_v14  ;;  %p903_p7 = scmp.ne.s32.totalorder %s1277_s4, %s902_s5  ;;  %s1020_s15 = smov [#allocation10]  }
  0x72   : > { %v445_v24 = vcvt.s32.f32 %v429_v15  ;;  %v446_v25 = vcvt.s32.f32 %v430_v16  ;;  %v447_v26 = vcvt.s32.f32 %v431_v17  ;;  %724 = vmatpush3.bf16.msra.mxu0 %v318_v7  ;;  %v320_v27 = vunpack.c.l.u8.bf16 %v309_v18  ;;  %s906_s30 = sshll.u32 %s1020_s15, 4  ;;  %s907_s30 = int_to_ptr.vmem [resolvable:$false] %s906_s30 }
  0x73   : > { %725 = vmatprep.subr.bf16.mxu0 %v319_v20  ;;  %v419_v28 = vunpack.c.2.s8 %v309_v18  ;;  %v420_v29 = vunpack.c.3.s8 %v309_v18  ;;  %v433_v30 = vand.u32 255, %v417_v21  ;;  %v448_v31 = vcvt.s32.f32 %v432_v23  ;;  %p904_p0 = pnand %p903_p7, %p1363_p4  ;;  %s908_s26 = scalar_lea.vmem %s907_s30, 1024 }
  0x74   : > { %v461_v32 = vadd.f32 %v446_v25, %v445_v24  ;;  %v434_v33 = vand.u32 255, %v418_v22  ;;  %v421_v38 = vunpack.c.0.s8 %v310_v34  ;;  %v321_v40 = vunpack.c.h.u8.bf16 %v309_v18  ;;  %p909_p8 = scmp.lt.s32.totalorder %s1277_s4, %s907_s30  ;;  %p910_p11 = scmp.lt.s32.totalorder %s908_s26, %s902_s5 }
  0x75   : > { %397 = vadd.xlane.f32.xlu0 %v392_v12  ;;  %401 = vadd.xlane.f32.xlu1 %v394_v19  ;;  %v435_v36 = vand.u32 255, %v419_v28  ;;  %v449_v37 = vcvt.s32.f32 %v433_v30  ;;  %v436_v39 = vand.u32 255, %v420_v29  ;;  %v422_v43 = vunpack.c.1.s8 %v310_v34  ;;  %v412_v30 = vld [vmem:[#allocation4] sm:$0x1]  ;;  %p905_p6 = pneg %p904_p0 }
  0x76   : > { %v462_v35 = vadd.f32 %v461_v32, %v447_v26  ;;  %726 = vmatpush3.bf16.msra.mxu0 %v319_v20  ;;  %v450_v42 = vcvt.s32.f32 %v434_v33  ;;  %v423_v46 = vunpack.c.2.s8 %v310_v34  ;;  %v437_v47 = vand.u32 255, %v421_v38  ;;  %v383_v33 = vld [vmem:[#allocation3] sm:$0xff]  ;;  %p911_p1 = por %p910_p11, %p909_p8 }
  0x77   : > { %727 = vmatprep.subr.bf16.mxu0 %v320_v27  ;;  %v451_v44 = vcvt.s32.f32 %v435_v36  ;;  %v452_v48 = vcvt.s32.f32 %v436_v39  ;;  %v322_v49 = vunpack.c.l.u8.bf16 %v310_v34  ;;  %v424_v51 = vunpack.c.3.s8 %v310_v34  ;;  %v386_v39 = vld [vmem:[#allocation3 + $0x18] sm:$0xff] }
  0x78   : > { %v463_v41 = vadd.f32 %v462_v35, %v448_v31  ;;  %v438_v52 = vand.u32 255, %v422_v43  ;;  %v316_v53 = vunpack.c.l.s8.bf16 %v1259_v1  ;;  %v439_v56 = vand.u32 255, %v423_v46  ;;  %p912_p12 = pnand %p911_p1, %p905_p6 }
  0x79   : > { %v453_v57 = vcvt.s32.f32 %v437_v47  ;;  %v425_v58 = vunpack.c.0.s8 %v311_v54  ;;  %v323_v59 = vunpack.c.h.u8.bf16 %v310_v34  ;;  %v440_v61 = vand.u32 255, %v424_v51  ;;  %v385_v34 = vld [vmem:[#allocation3 + $0x10] sm:$0xff] }
  0x7a   : > { %v464_v45 = vadd.f32 %v463_v41, %v449_v37  ;;  %728 = vmatpush3.bf16.msra.mxu0 %v320_v27  ;;  %739 = vmatprep.mubr.bf16.mxu0 %v316_v53  ;;  %v454_v62 = vcvt.s32.f32 %v438_v52  ;;  %v426_v63 = vunpack.c.1.s8 %v311_v54  ;;  %v455_v0 = vcvt.s32.f32 %v439_v56 }
  0x7b   : > { %729 = vmatprep.subr.bf16.mxu0 %v321_v40  ;;  %v427_v3 = vunpack.c.2.s8 %v311_v54  ;;  %v441_v4 = vand.u32 255, %v425_v58  ;;  %v324_v5 = vunpack.c.l.u8.bf16 %v311_v54  ;;  %v456_v6 = vcvt.s32.f32 %v440_v61 }
  0x7c   : > { %v465_v50 = vadd.f32 %v464_v45, %v450_v42  ;;  %v428_v8 = vunpack.c.3.s8 %v311_v54  ;;  %v442_v9 = vand.u32 255, %v426_v63  ;;  %v1019_v13 = vmov 0  }
  0x7d   : > { %v443_v11 = vand.u32 255, %v427_v3  ;;  %v457_v12 = vcvt.s32.f32 %v441_v4  ;;  %840 = vset.pattern.permute.xlu0 %v1019_v13  ;;  %v325_v14 = vunpack.c.h.u8.bf16 %v311_v54  ;;  %841 = vset.pattern.permute.xlu1 %v1019_v13  ;;  %v317_v22 = vunpack.c.h.s8.bf16 %v1259_v1  ;;  %v384_v1 = vld [vmem:[#allocation3 + $0x8] sm:$0xff] }
  0x7e   : > { %v466_v55 = vadd.f32 %v465_v50, %v451_v44  ;;  %730 = vmatpush3.bf16.msra.mxu0 %v321_v40  ;;  %v444_v16 = vand.u32 255, %v428_v8  ;;  %v458_v17 = vcvt.s32.f32 %v442_v9  ;;  %v526_v56 = vlaneseq }
  0x7f   : > { %731 = vmatprep.subr.bf16.mxu0 %v322_v49  ;;  %v459_v18 = vcvt.s32.f32 %v443_v11 }
  0x80   : > { %v467_v60 = vadd.f32 %v466_v55, %v452_v48  ;;  %v460_v20 = vcvt.s32.f32 %v444_v16 }
  0x82   : > { %v468_v2 = vadd.f32 %v467_v60, %v453_v57  ;;  %732 = vmatpush3.bf16.msra.mxu0 %v322_v49  ;;  %v527_v57 = vshrl.u32 %v526_v56, 7 }
  0x83   : > { %733 = vmatprep.subr.bf16.mxu0 %v323_v59 }
  0x84   : > { %v469_v7 = vadd.f32 %v468_v2, %v454_v62  ;;  %v528_v60 = vsub.s32 0, %v527_v57 }
  0x86   : > { %v470_v10 = vadd.f32 %v469_v7, %v455_v0  ;;  %734 = vmatpush3.bf16.msra.mxu0 %v323_v59 }
  0x87   : > { %735 = vmatprep.subr.bf16.mxu0 %v324_v5 }
  0x88   : > { %v471_v15 = vadd.f32 %v470_v10, %v456_v6 }
  0x8a   : > { %v472_v19 = vadd.f32 %v471_v15, %v457_v12  ;;  %736 = vmatpush3.bf16.msra.mxu0 %v324_v5 }
  0x8b   : > { %737 = vmatprep.subr.bf16.mxu0 %v325_v14 }
  0x8c   : > { %v473_v21 = vadd.f32 %v472_v19, %v458_v17 }
  0x8e   : > { %v474_v23 = vadd.f32 %v473_v21, %v459_v18  ;;  %738 = vmatpush3.bf16.msra.mxu0 %v325_v14 }
  0x90   : > { %v475_v24 = vadd.f32 %v474_v23, %v460_v20 }
  0x91   : > { %740 = vmatmul.mubr.bf16.vlgmr.msra.gmra.mrb[0].mxu0 %v317_v22 }
  0x92   : > { %v476_v25 = vrot.slane %v475_v24, 4 }
  0x94   : > { %v477_v26 = vadd.f32 %v476_v25, %v475_v24 }
  0x96   : > { %v478_v27 = vrot.slane %v477_v26, 2 }
  0x98   : > { %v479_v28 = vadd.f32 %v478_v27, %v477_v26 }
  0x9a   : > { %v480_v29 = vrot.slane %v479_v28, 1 }
  0x9c   : > { %v481_v31 = vadd.f32 %v480_v29, %v479_v28 }
  0x9e   : > { %v482_v32 = vadd.f32 %v481_v31, %v412_v30 }
  0xa0   : > { %483 = vst [vmem:[#allocation4] sm:$0x1] %v482_v32 }
  0xa7   : > { %v523_v58 = vld [vmem:[#allocation4] sm:$0x1] }
  0xa8   : > { %v524_v59 = vmul.f32 66.0, %v523_v58 }
  0xaa   : > { %v529_v61 = vrot.slane %v524_v59, %v528_v60 }
  0xfe   : > { %v396_v35 = vpop.xlane.xlu0 %395  ;;  %v400_v36 = vpop.xlane.xlu1 %399 }
  0xff   : > { %v403_v37 = vadd.f32 %v396_v35, %v383_v33  ;;  %v405_v38 = vadd.f32 %v400_v36, %v385_v34 }
 0x101   : > { %408 = vst.msk [vmem:[#allocation3] sm:$0xff] %vm301_vm0, %v403_v37  ;;  %410 = vst.msk [vmem:[#allocation3 + $0x10] sm:$0xff] %vm301_vm0, %v405_v38 }
 0x102   : > { %v398_v40 = vpop.xlane.xlu0 %397  ;;  %v402_v41 = vpop.xlane.xlu1 %401 }
 0x103   : > { %v404_v42 = vadd.f32 %v398_v40, %v384_v1  ;;  %v406_v43 = vadd.f32 %v402_v41, %v386_v39 }
 0x105   : > { %409 = vst.msk [vmem:[#allocation3 + $0x8] sm:$0xff] %vm301_vm0, %v404_v42  ;;  %411 = vst.msk [vmem:[#allocation3 + $0x18] sm:$0xff] %vm301_vm0, %v406_v43 }
 0x108   : > { %v491_v44 = vld [vmem:[#allocation3] sm:$0xff]  ;;  %v493_v47 = vld [vmem:[#allocation3 + $0x10] sm:$0xff] }
 0x109   : > { %v495_v45 = vmul.f32 -160.0, %v491_v44  ;;  %v497_v49 = vmul.f32 -160.0, %v493_v47 }
 0x10b   : > { %501 = vperm.xlu0 %840, %v495_v45  }
 0x10c   : > { %v492_v46 = vld [vmem:[#allocation3 + $0x8] sm:$0xff]  ;;  %v494_v50 = vld [vmem:[#allocation3 + $0x18] sm:$0xff] }
 0x10d   : > { %v496_v48 = vmul.f32 -160.0, %v492_v46  ;;  %v498_v51 = vmul.f32 -160.0, %v494_v50 }
 0x10f   : > { %506 = vperm.xlu1 %841, %v496_v48  }
 0x113   : > { %511 = vperm.xlu1 %841, %v497_v49  }
 0x117   : > { %516 = vperm.xlu1 %841, %v498_v51  }
 0x164   : > { %v741_v52 = vpop.f32.mrb[0].mxu0 }
 0x165   : > { %v360_v53 = vpop.f32.mrb[1].mxu0 }
 0x166   : > { %v742_v54 = vpop.f32.mrb[2].mxu0 }
 0x167   : > { %v363_v55 = vpop.f32.mrb[3].mxu0 }
 0x18a   : > { %v502_v62 = vpop.permute.xlu0 %501 }
 0x18b   : > { %v519_v63 = vadd.f32 %v502_v62, %v360_v53 }
 0x18d   : > { %v531_v0 = vadd.f32 %v529_v61, %v519_v63 }
 0x18e   : > { %v507_v2 = vpop.permute.xlu1 %506 }
 0x18f   : > { %v535_v3 = vadd.f32 -1351680.0, %v531_v0  ;;  %v520_v4 = vadd.f32 %v507_v2, %v363_v55 }
 0x191   : > { %v539_v5 = vmul.f32 0.00075, %v535_v3  ;;  %v532_v6 = vadd.f32 %v529_v61, %v520_v4 }
 0x192   : > { %v512_v7 = vpop.permute.xlu1 %511 }
 0x193   : > { %543 = vst [vmem:[%s277_s27] sm:$0xff] %v539_v5  ;;  %v536_v8 = vadd.f32 -1351680.0, %v532_v6  ;;  %v521_v9 = vadd.f32 %v741_v52, %v512_v7 }
 0x195   : > { %v540_v10 = vmul.f32 0.00075, %v536_v8  ;;  %v533_v11 = vadd.f32 %v529_v61, %v521_v9 }
 0x196   : > { %v517_v12 = vpop.permute.xlu1 %516 }
 0x197   : > { %544 = vst [vmem:[%s277_s27 + $0x8] sm:$0xff] %v540_v10  ;;  %v537_v13 = vadd.f32 -1351680.0, %v533_v11  ;;  %v522_v14 = vadd.f32 %v742_v54, %v517_v12 }
 0x199   : > { %v541_v15 = vmul.f32 0.00075, %v537_v13  ;;  %v534_v16 = vadd.f32 %v529_v61, %v522_v14 }
 0x19b   : > { %545 = vst [vmem:[%s277_s27 + $0x10] sm:$0xff] %v541_v15  ;;  %v538_v17 = vadd.f32 -1351680.0, %v534_v16 }
 0x19d   : > { %v542_v18 = vmul.f32 0.00075, %v538_v17 }
 0x19f   : > { %546 = vst [vmem:[%s277_s27 + $0x18] sm:$0xff] %v542_v18 }
 0x1a0   : > { %915 = shalt.err (!%p912_p12)
}
 0x1a1   : > { %s916_s7 = scalar_lea.hbm %s1282_s21, 512  ;;  %s920_s19 = scalar_lea.hbm %s1341_s2, 7168 }
 0x1a2   : > { %p917_p10 = scmp.ne.s32.totalorder %s1282_s21, %s916_s7  ;;  %p921_p5 = scmp.lt.u32.totalorder %s1282_s21, %s1341_s2 }
 0x1a3   : > { %p922_p13 = scmp.lt.u32.totalorder %s920_s19, %s916_s7  ;;  %p924_p7 = scmp.lt.u32.totalorder %s916_s7, %s1282_s21 }
 0x1a4   : > { %p918_p9 = pnand %p917_p10, %p1363_p4 }
 0x1a5   : > { %p923_p3 = por %p922_p13, %p921_p5 }
 0x1a6   : > { %p919_p2 = pneg %p918_p9 }
 0x1a7   : > { %p925_p0 = por %p924_p7, %p923_p3 }
 0x1a9   : > { %p926_p6 = pnand %p925_p0, %p919_p2 }
 0x1ab   : > { %929 = shalt.err (!%p926_p6)
}
 0x1ac   : > { %s1021_s24 = smov 128   ;;  %s1022_s27 = smov 8  }
 0x1ad   : > { %747 = dma.vmem_to_hbm [thread:$0]  (%p1363_p4), %s1277_s4, 512, %s1282_s21, %s548_s25, %s1021_s24, %s1021_s24, %s1022_s27  }
 0x1ae PF: > { %p761_p8 = scmp.ge.s32.totalorder %s1012_s17, 2  ;;  %s579_s9 = sand.u32 1, %s992_s12  }
 0x1af   : > { %p1364_p11 = scmp.ne.s32.totalorder %s1354_s29, 0  ;;  %s580_s6 = scalar_lea.sflag [#allocation7], %s579_s9 }
 0x1b1   : > { %p757_p1 = pnand %p761_p8, %p1364_p11 }
 0x1b3   : > { %975 = dma.done.wait (!%p757_p1), %s580_s6, 512  }
 0x1b4   : > { %977 = vsyncadd (!%p757_p1), %s580_s6, 4294966784  ;;  %s21_s17 = sadd.s32 1, %s1012_s17   ;;  %s1365_s28 = sld [smem:[#allocation15_spill]] }
 0x1b5   : > { %p18_p12 = scmp.ge.s32.totalorder %s21_s17, 16   ;;  %s1366_s0 = sld [smem:[#allocation14_spill]] }
 0x1b6   : > { %s1367_s9 = smov %s984_s10  ;;  %s1368_s10 = smov %s988_s11 }
 0x1b7   : > { %s1369_s11 = smov %s1207_s18  ;;  %s1370_s12 = smov %s996_s13 }
 0x1b8   : > { %s1371_s13 = smov %s1000_s14  ;;  %s1373_s15 = smov %s1008_s16 }
 0x1b9   :  { %20 = sbr.rel (!%p18_p12) target bundleno = 12 (0xc), region = 94 }
 0x1ba   : > { %s1372_s14 = smov %s1365_s28 }
 0x1bb   : > { %s1374_s16 = smov %s1366_s0 }
 0x1c0   :  { %585 = vsyncpa [#allocation6], 1 }
 0x1c1   :  { %587 = vsyncpa [#allocation6 + $0x1], 1 }
 0x1c2   :  { %588 = vsyncpa [#allocation9], 1 }
 0x1c3   :  { %590 = vsyncpa [#allocation9 + $0x1], 1 }
 0x1c4   :  { %591 = vsyncpa [#allocation7], 1 }
 0x1c5   :  { %593 = vsyncpa [#allocation7 + $0x1], 1 }

</bundles_post_ra>
